<compile_context>
chip_gen: v6e
topology: v6e:2x2x1
jax: 0.10.0
libtpu: 0.0.40
codegen_flags: <defaults>
</compile_context>

<pallas_src>
from functools import partial

import jax
import jax.numpy as jnp
from jax.experimental import pallas as pl
from jax.experimental.pallas import tpu as pltpu


# ----------------------------------------------------------------------------
# Kernel body
# ----------------------------------------------------------------------------
def _fused_mlp_kernel(*refs, num_layers):
    """refs = (x_ref, w0, b0, w1, b1, ..., w_{L-1}, b_{L-1}, o_ref).

    y = relu(x @ W0 + b0) -> ... -> y @ W_last + b_last, entirely in
    vregs/VMEM; only the final (lane-dense) result is stored.
    bf16 MXU inputs, f32 accumulation, bias-add/ReLU in f32.
    """
    x_ref = refs[0]
    o_ref = refs[-1]
    wb_refs = refs[1:-1]

    y_lo = x_ref[...]  # bf16
    for i in range(num_layers):
        w = wb_refs[2 * i][...]                              # bf16 (Din_p, H_p)
        b = wb_refs[2 * i + 1][...].astype(jnp.float32)      # (1, H_p) in f32
        y = jnp.dot(y_lo, w, preferred_element_type=jnp.float32) + b
        if i < num_layers - 1:          # hidden layers: ReLU (Dropout=identity)
            y = jnp.maximum(y, 0.0)
            y_lo = y.astype(jnp.bfloat16)   # cast only at the next dot input
        else:
            o_ref[...] = y.astype(o_ref.dtype)


# ----------------------------------------------------------------------------
# Parameter prep: BN fold (f32) + lane padding + bf16 cast
# ----------------------------------------------------------------------------
def _round_up(n, m):
    return ((n + m - 1) // m) * m


def _pad_dim(d):
    # <=128 -> 128 (lane width); >=128 -> multiple of 256 (2x256x256 MXU on
    # v6e/v7x; harmless slight over-pad on v5e's 128-wide MXU).
    return 128 if d <= 128 else _round_up(d, 256)


def _fold_and_pad(params):
    """Fold eval-mode BN into (W, b) in f32, zero-pad feature dims, cast bf16.

    Returns (list of (W_pad_bf16, b_pad_bf16), padded_dims) where padded_dims
    is [Din_pad, H1_pad, ..., Dout_pad].
    """
    folded = []
    for layer in params[:-1]:
        w32 = layer["w"].astype(jnp.float32)
        b32 = layer["b"].astype(jnp.float32)
        s32 = layer["scale"].astype(jnp.float32)
        t32 = layer["shift"].astype(jnp.float32)
        folded.append((w32 * s32, b32 * s32 + t32))          # fold in f32
    last = params[-1]
    folded.append((last["w"].astype(jnp.float32), last["b"].astype(jnp.float32)))

    dims = [folded[0][0].shape[0]] + [w.shape[1] for w, _ in folded]
    pdims = [_pad_dim(d) for d in dims]

    padded = []
    for i, (w, b) in enumerate(folded):
        din, dout = w.shape
        din_p, dout_p = pdims[i], pdims[i + 1]
        w_p = jnp.pad(w, ((0, din_p - din), (0, dout_p - dout)))
        b_p = jnp.pad(b, ((0, 0), (0, dout_p - dout)))
        padded.append((w_p.astype(jnp.bfloat16), b_p.astype(jnp.bfloat16)))
    return padded, pdims


# ----------------------------------------------------------------------------
# Wrapper
# ----------------------------------------------------------------------------
def multiple_net_forward(x, params, *, batch_tile=None):
    """Fused MultipleNet forward: one pallas_call for the whole network."""
    B, Din = x.shape
    padded, pdims = _fold_and_pad(params)
    num_layers = len(padded)
    Din_pad = pdims[0]
    Dout = params[-1]["w"].shape[1]
    Dout_pad = pdims[-1]
    H_max_pad = max(pdims[1:])

    # --- generation / capacity hints (best effort) ---------------------------
    try:
        device_kind = jax.devices()[0].device_kind.lower()
    except Exception:  # pragma: no cover
        device_kind = ""
    is_v7x = "v7" in device_kind
    try:
        vmem_capacity = int(pltpu.get_tpu_info().vmem_capacity_bytes)
    except Exception:  # pragma: no cover
        vmem_capacity = 64 * (1 << 20)  # conservative (v7x per-TC)

    # Resident weight/bias bytes (single-buffered bf16).
    weight_bytes = sum(w.size * 2 + b.size * 2 for w, b in padded)

    def footprint(bt):
        x_tiles = 2 * bt * Din_pad * 2            # bf16, double-buffered
        out_tiles = 2 * bt * Dout_pad * 4         # f32, double-buffered
        interm = 2 * bt * H_max_pad * 4           # f32 intermediates headroom
        return weight_bytes + x_tiles + out_tiles + interm

    # --- batch tile heuristic -------------------------------------------------
    if batch_tile is None:
        batch_tile = B if B <= 1024 else 1024
    if batch_tile != B:
        batch_tile = max(8, (batch_tile // 8) * 8)
    if is_v7x and B >= 16:
        # Ensure >=2 grid steps so the "parallel" axis shards across both TCs.
        batch_tile = min(batch_tile, max(8, (B // 2 // 8) * 8))
    # Shrink to fit VMEM (leave headroom under physical capacity).
    budget = int(0.7 * vmem_capacity)
    while batch_tile > 8 and footprint(batch_tile) > budget:
        batch_tile = max(8, (batch_tile // 2 // 8) * 8)
    # TODO(synk): if resident weights alone exceed the VMEM budget (huge
    # hidden sizes), fall back to streaming the largest layer over K/N tiles.

    grid = (pl.cdiv(B, batch_tile),)

    # --- inputs & specs -------------------------------------------------------
    x_pad = jnp.pad(x, ((0, 0), (0, Din_pad - Din))).astype(jnp.bfloat16)

    in_specs = [pl.BlockSpec((batch_tile, Din_pad), lambda i: (i, 0))]
    inputs = [x_pad]
    for w, b in padded:
        # Constant index_map -> fetched once; Buffered(1) -> no wasted second
        # buffer, halving the resident-weight VMEM footprint.
        in_specs.append(
            pl.BlockSpec(w.shape, lambda i: (0, 0), pipeline_mode=pl.Buffered(1)))
        in_specs.append(
            pl.BlockSpec(b.shape, lambda i: (0, 0), pipeline_mode=pl.Buffered(1)))
        inputs.extend([w, b])

    out_specs = pl.BlockSpec((batch_tile, Dout_pad), lambda i: (i, 0))

    est_bytes = footprint(batch_tile)
    vmem_limit = int(min(100 * (1 << 20), max(32 * (1 << 20), 2 * est_bytes)))

    flops = 2 * B * sum(pdims[i] * pdims[i + 1] for i in range(num_layers))
    bytes_accessed = (x_pad.size * 2 + weight_bytes + B * Dout_pad * 4)

    kernel = partial(_fused_mlp_kernel, num_layers=num_layers)
    out_pad = pl.pallas_call(
        kernel,
        out_shape=jax.ShapeDtypeStruct((B, Dout_pad), jnp.float32),
        grid=grid,
        in_specs=in_specs,
        out_specs=out_specs,
        compiler_params=pltpu.CompilerParams(
            dimension_semantics=("parallel",),   # shards batch across TCs (v7x)
            vmem_limit_bytes=vmem_limit,
        ),
        cost_estimate=pl.CostEstimate(
            flops=flops, transcendentals=0, bytes_accessed=bytes_accessed),
    )(*inputs)

    return out_pad[:, :Dout].astype(x.dtype)


# ----------------------------------------------------------------------------
# Params + reference
# ----------------------------------------------------------------------------
def init_params(key, n_input, n_hiddens, n_output, dtype=jnp.float32):
    """Deterministic params mimicking PyTorch defaults (U(-1/sqrt(fan_in), .))."""
    params = []
    in_dim = n_input
    bn_eps = 1e-5
    for h in n_hiddens:
        key, kw, kb = jax.random.split(key, 3)
        bound = 1.0 / (in_dim ** 0.5)
        w = jax.random.uniform(kw, (in_dim, h), dtype, -bound, bound)
        b = jax.random.uniform(kb, (1, h), dtype, -bound, bound)
        # BatchNorm1d init: gamma=1, beta=0, running_mean=0, running_var=1
        gamma = jnp.ones((1, h), dtype)
        beta = jnp.zeros((1, h), dtype)
        running_mean = jnp.zeros((1, h), dtype)
        running_var = jnp.ones((1, h), dtype)
        scale = gamma / jnp.sqrt(running_var + bn_eps)
        shift = beta - running_mean * scale
        params.append(dict(w=w, b=b, scale=scale, shift=shift))
        in_dim = h
    key, kw, kb = jax.random.split(key, 3)
    bound = 1.0 / (in_dim ** 0.5)
    w = jax.random.uniform(kw, (in_dim, n_output), dtype, -bound, bound)
    b = jax.random.uniform(kb, (1, n_output), dtype, -bound, bound)
    params.append(dict(w=w, b=b))
    return params


def multiple_net_reference(x, params):
    """Pure-JAX reference mirroring the kernel numerics (bf16 weights/acts,
    f32 accumulation, BN folded in f32)."""
    padded, pdims = _fold_and_pad(params)
    Dout = params[-1]["w"].shape[1]
    y_lo = jnp.pad(x, ((0, 0), (0, pdims[0] - x.shape[1]))).astype(jnp.bfloat16)
    for i, (w, b) in enumerate(padded):
        y = jnp.dot(y_lo, w, preferred_element_type=jnp.float32) \
            + b.astype(jnp.float32)
        if i < len(padded) - 1:
            y = jnp.maximum(y, 0.0)
            y_lo = y.astype(jnp.bfloat16)
    return y[:, :Dout].astype(x.dtype)


def multiple_net_reference_f32(x, params):
    """Full-f32 reference (un-folded BN) for a sanity check."""
    out = x
    for layer in params[:-1]:
        y = out @ layer["w"] + layer["b"]
        y = y * layer["scale"] + layer["shift"]   # BN (eval, running stats)
        out = jnp.maximum(y, 0.0)                 # Dropout = identity in eval
    last = params[-1]
    return out @ last["w"] + last["b"]


if __name__ == "__main__":
    n_input, n_hiddens, n_output = 32, (64, 48), 16
    batch = 8

    key = jax.random.PRNGKey(0)
    key, kx = jax.random.split(key)
    x = jax.random.normal(kx, (batch, n_input), jnp.float32)

    params = init_params(key, n_input, n_hiddens, n_output)

    out = multiple_net_forward(x, params)
    out = jax.block_until_ready(out)
    assert out.shape == (batch, n_output)

    # Tight check vs a reference with identical bf16/f32 numerics.
    ref = multiple_net_reference(x, params)
    assert jnp.allclose(out, ref, atol=1e-2, rtol=1e-2)

    # Looser sanity check vs the full-f32 math of the original module.
    ref32 = multiple_net_reference_f32(x, params)
    assert jnp.allclose(out, ref32, atol=5e-2, rtol=5e-2)

    print("KERNEL_OK")
</pallas_src>

<mosaic_0001>
module attributes {stable_mosaic.version = 11 : i64} {
  func.func @_fused_mlp_kernel(%arg0: i32, %arg1: memref<8x128xbf16, #tpu.memory_space<vmem>>, %arg2: memref<128x128xbf16, #tpu.memory_space<vmem>>, %arg3: memref<1x128xbf16, #tpu.memory_space<vmem>>, %arg4: memref<128x128xbf16, #tpu.memory_space<vmem>>, %arg5: memref<1x128xbf16, #tpu.memory_space<vmem>>, %arg6: memref<128x128xbf16, #tpu.memory_space<vmem>>, %arg7: memref<1x128xbf16, #tpu.memory_space<vmem>>, %arg8: memref<8x128xf32, #tpu.memory_space<vmem>>) attributes {dimension_semantics = [#tpu.dimension_semantics<parallel>], iteration_bounds = array<i64: 1>, scalar_prefetch = 0 : i64, scratch_operands = 0 : i64, tpu.core_type = #tpu.core_type<tc>, window_params = [{transform_indices = @transform_0, window_bounds = array<i64: 8, 128>}, {pipeline_mode = #tpu.pipeline_mode<synchronous>, transform_indices = @transform_1, window_bounds = array<i64: 128, 128>}, {pipeline_mode = #tpu.pipeline_mode<synchronous>, transform_indices = @transform_2, window_bounds = array<i64: 1, 128>}, {pipeline_mode = #tpu.pipeline_mode<synchronous>, transform_indices = @transform_3, window_bounds = array<i64: 128, 128>}, {pipeline_mode = #tpu.pipeline_mode<synchronous>, transform_indices = @transform_4, window_bounds = array<i64: 1, 128>}, {pipeline_mode = #tpu.pipeline_mode<synchronous>, transform_indices = @transform_5, window_bounds = array<i64: 128, 128>}, {pipeline_mode = #tpu.pipeline_mode<synchronous>, transform_indices = @transform_6, window_bounds = array<i64: 1, 128>}, {transform_indices = @transform_7, window_bounds = array<i64: 8, 128>}]} {
    %c0 = arith.constant 0 : index
    %c0_0 = arith.constant 0 : index
    %0 = vector.load %arg1[%c0, %c0_0] : memref<8x128xbf16, #tpu.memory_space<vmem>>, vector<8x128xbf16>
    %c0_1 = arith.constant 0 : index
    %c0_2 = arith.constant 0 : index
    %1 = vector.load %arg2[%c0_1, %c0_2] : memref<128x128xbf16, #tpu.memory_space<vmem>>, vector<128x128xbf16>
    %c0_3 = arith.constant 0 : index
    %c0_4 = arith.constant 0 : index
    %2 = vector.load %arg3[%c0_3, %c0_4] : memref<1x128xbf16, #tpu.memory_space<vmem>>, vector<1x128xbf16>
    %3 = arith.extf %2 : vector<1x128xbf16> to vector<1x128xf32>
    %cst = arith.constant dense<0.000000e+00> : vector<8x128xf32>
    %4 = tpu.matmul %0, %1, %cst {dimension_numbers = #tpu.dot_dimension_numbers<[1], [0], [0], [1], [0, 0, 1, 1], [], []>} : vector<8x128xbf16>, vector<128x128xbf16>, vector<8x128xf32> -> vector<8x128xf32>
    %5 = vector.broadcast %3 : vector<1x128xf32> to vector<8x128xf32>
    %6 = arith.addf %4, %5 : vector<8x128xf32>
    %cst_5 = arith.constant 0.000000e+00 : f32
    %7 = vector.broadcast %cst_5 : f32 to vector<8x128xf32>
    %8 = arith.maximumf %6, %7 : vector<8x128xf32>
    %9 = arith.truncf %8 : vector<8x128xf32> to vector<8x128xbf16>
    %c0_6 = arith.constant 0 : index
    %c0_7 = arith.constant 0 : index
    %10 = vector.load %arg4[%c0_6, %c0_7] : memref<128x128xbf16, #tpu.memory_space<vmem>>, vector<128x128xbf16>
    %c0_8 = arith.constant 0 : index
    %c0_9 = arith.constant 0 : index
    %11 = vector.load %arg5[%c0_8, %c0_9] : memref<1x128xbf16, #tpu.memory_space<vmem>>, vector<1x128xbf16>
    %12 = arith.extf %11 : vector<1x128xbf16> to vector<1x128xf32>
    %cst_10 = arith.constant dense<0.000000e+00> : vector<8x128xf32>
    %13 = tpu.matmul %9, %10, %cst_10 {dimension_numbers = #tpu.dot_dimension_numbers<[1], [0], [0], [1], [0, 0, 1, 1], [], []>} : vector<8x128xbf16>, vector<128x128xbf16>, vector<8x128xf32> -> vector<8x128xf32>
    %14 = vector.broadcast %12 : vector<1x128xf32> to vector<8x128xf32>
    %15 = arith.addf %13, %14 : vector<8x128xf32>
    %cst_11 = arith.constant 0.000000e+00 : f32
    %16 = vector.broadcast %cst_11 : f32 to vector<8x128xf32>
    %17 = arith.maximumf %15, %16 : vector<8x128xf32>
    %18 = arith.truncf %17 : vector<8x128xf32> to vector<8x128xbf16>
    %c0_12 = arith.constant 0 : index
    %c0_13 = arith.constant 0 : index
    %19 = vector.load %arg6[%c0_12, %c0_13] : memref<128x128xbf16, #tpu.memory_space<vmem>>, vector<128x128xbf16>
    %c0_14 = arith.constant 0 : index
    %c0_15 = arith.constant 0 : index
    %20 = vector.load %arg7[%c0_14, %c0_15] : memref<1x128xbf16, #tpu.memory_space<vmem>>, vector<1x128xbf16>
    %21 = arith.extf %20 : vector<1x128xbf16> to vector<1x128xf32>
    %cst_16 = arith.constant dense<0.000000e+00> : vector<8x128xf32>
    %22 = tpu.matmul %18, %19, %cst_16 {dimension_numbers = #tpu.dot_dimension_numbers<[1], [0], [0], [1], [0, 0, 1, 1], [], []>} : vector<8x128xbf16>, vector<128x128xbf16>, vector<8x128xf32> -> vector<8x128xf32>
    %23 = vector.broadcast %21 : vector<1x128xf32> to vector<8x128xf32>
    %24 = arith.addf %22, %23 : vector<8x128xf32>
    %c0_17 = arith.constant 0 : index
    %c0_18 = arith.constant 0 : index
    %25 = vector.load %arg8[%c0_17, %c0_18] : memref<8x128xf32, #tpu.memory_space<vmem>>, vector<8x128xf32>
    tpu.vector_store %arg8[%c0_17, %c0_18], %24 {strides = array<i32>} : memref<8x128xf32, #tpu.memory_space<vmem>>, vector<8x128xf32>,
    return
  }
  func.func @transform_0(%arg0: i32) -> (i32, i32) {
    %c0_i32 = arith.constant 0 : i32
    %c0_i32_0 = arith.constant 0 : i32
    return %arg0, %c0_i32 : i32, i32
  }
  func.func @transform_1(%arg0: i32) -> (i32, i32) {
    %c0_i32 = arith.constant 0 : i32
    %c0_i32_0 = arith.constant 0 : i32
    %c0_i32_1 = arith.constant 0 : i32
    return %c0_i32, %c0_i32_0 : i32, i32
  }
  func.func @transform_2(%arg0: i32) -> (i32, i32) {
    %c0_i32 = arith.constant 0 : i32
    %c0_i32_0 = arith.constant 0 : i32
    %c0_i32_1 = arith.constant 0 : i32
    return %c0_i32, %c0_i32_0 : i32, i32
  }
  func.func @transform_3(%arg0: i32) -> (i32, i32) {
    %c0_i32 = arith.constant 0 : i32
    %c0_i32_0 = arith.constant 0 : i32
    %c0_i32_1 = arith.constant 0 : i32
    return %c0_i32, %c0_i32_0 : i32, i32
  }
  func.func @transform_4(%arg0: i32) -> (i32, i32) {
    %c0_i32 = arith.constant 0 : i32
    %c0_i32_0 = arith.constant 0 : i32
    %c0_i32_1 = arith.constant 0 : i32
    return %c0_i32, %c0_i32_0 : i32, i32
  }
  func.func @transform_5(%arg0: i32) -> (i32, i32) {
    %c0_i32 = arith.constant 0 : i32
    %c0_i32_0 = arith.constant 0 : i32
    %c0_i32_1 = arith.constant 0 : i32
    return %c0_i32, %c0_i32_0 : i32, i32
  }
  func.func @transform_6(%arg0: i32) -> (i32, i32) {
    %c0_i32 = arith.constant 0 : i32
    %c0_i32_0 = arith.constant 0 : i32
    %c0_i32_1 = arith.constant 0 : i32
    return %c0_i32, %c0_i32_0 : i32, i32
  }
  func.func @transform_7(%arg0: i32) -> (i32, i32) {
    %c0_i32 = arith.constant 0 : i32
    %c0_i32_0 = arith.constant 0 : i32
    return %arg0, %c0_i32 : i32, i32
  }
}

</mosaic_0001>

<bundles_post_ra>
// kernel: tpu_custom_call.1
= control target key start
LH: loop header
LB: loop body
LE: loop exit
PB: predicated region body
PF: predicated region fallthrough
CT: control target
= control target key end

     0   :  { %12 = vsyncpa [#allocation3], 0  ;;  %s798_s0 = inlined_call_operand.hbm [shape: bf16[8,128], index: 0, kind: input, shape index: {}]   ;;  %s799_s1 = inlined_call_operand.hbm [shape: bf16[128,128], index: 1, kind: input, shape index: {}]   ;;  %s800_s2 = inlined_call_operand.vmem [shape: bf16[1,128], index: 2, kind: input, shape index: {}]   ;;  %s801_s3 = inlined_call_operand.hbm [shape: bf16[128,128], index: 3, kind: input, shape index: {}]   ;;  %s802_s4 = inlined_call_operand.vmem [shape: bf16[1,128], index: 4, kind: input, shape index: {}]   ;;  %s803_s5 = inlined_call_operand.hbm [shape: bf16[128,128], index: 5, kind: input, shape index: {}]   ;;  %s804_s6 = inlined_call_operand.vmem [shape: bf16[1,128], index: 6, kind: input, shape index: {}]   ;;  %s805_s7 = inlined_call_operand.hbm [shape: f32[8,128], index: 7, kind: output, shape index: {}]  }
   0x1   :  { %13 = vsyncpa [#allocation6], 0 }
   0x2   :  { %14 = vsyncpa [#allocation9], 0 }
   0x3   :  { %15 = vsyncpa [#allocation4], 0  ;;  %s686_s24 = smov [#allocation5]  }
   0x4   :  { %s31_s25 = sshll.u32 %s686_s24, 4  ;;  %s32_s25 = int_to_ptr.vmem [resolvable:$true] %s31_s25 }
   0x5   :  { %s586_s26 = scalar_lea.vmem %s32_s25, 1024  ;;  %p591_p1 = scmp.lt.s32.totalorder %s32_s25, %s32_s25 }
   0x6   :  { %p587_p0 = scmp.ne.s32.totalorder %s32_s25, %s586_s26  ;;  %p592_p2 = scmp.lt.s32.totalorder %s586_s26, %s586_s26 }
   0x8   :  { %p593_p3 = por %p592_p2, %p591_p1 }
   0xa   :  { %p594_p4 = pnand %p593_p3, %p587_p0 }
   0xc   :  { %597 = shalt.err (!%p594_p4)
}
   0xd   :  { %s687_s27 = smov 64   ;;  %s688_s28 = smov 4  }
   0xe   :  { %37 = dma.hbm_to_vmem [thread:$0]  %s799_s1, 1024, %s32_s25, [#allocation6], %s687_s27, %s687_s27, %s688_s28  }
   0xf   :  { %s689_s8 = smov [#allocation2]   ;;  %s690_s10 = smov [#allocation7]  }
  0x10   :  { %s22_s9 = sshll.u32 %s689_s8, 4  ;;  %s45_s11 = sshll.u32 %s690_s10, 4  ;;  %s23_s9 = int_to_ptr.vmem [resolvable:$true] %s22_s9  ;;  %s46_s11 = int_to_ptr.vmem [resolvable:$true] %s45_s11 }
  0x11   :  { %s606_s12 = scalar_lea.vmem %s23_s9, 64  ;;  %p611_p6 = scmp.lt.s32.totalorder %s23_s9, %s23_s9 }
  0x12   :  { %p607_p5 = scmp.ne.s32.totalorder %s23_s9, %s606_s12  ;;  %p612_p7 = scmp.lt.s32.totalorder %s606_s12, %s606_s12 }
  0x14   :  { %p613_p8 = por %p612_p7, %p611_p6 }
  0x16   :  { %p614_p9 = pnand %p613_p8, %p607_p5 }
  0x18   :  { %617 = shalt.err (!%p614_p9)
}
  0x19   :  { %25 = dma.hbm_to_vmem [thread:$0]  %s798_s0, 64, %s23_s9, [#allocation3]  }
  0x1a   :  { %s626_s15 = scalar_lea.vmem %s46_s11, 1024  ;;  %p631_p11 = scmp.lt.s32.totalorder %s46_s11, %s46_s11 }
  0x1b   :  { %p627_p10 = scmp.ne.s32.totalorder %s46_s11, %s626_s15  ;;  %p632_p12 = scmp.lt.s32.totalorder %s626_s15, %s626_s15 }
  0x1d   :  { %p633_p13 = por %p632_p12, %p631_p11 }
  0x1f   :  { %p634_p0 = pnand %p633_p13, %p627_p10 }
  0x21   :  { %637 = shalt.err (!%p634_p0)
}
  0x22   :  { %51 = dma.hbm_to_vmem [thread:$0]  %s801_s3, 1024, %s46_s11, [#allocation6], %s687_s27, %s687_s27, %s688_s28  }
  0x23   :  { %s691_s17 = smov [#allocation8]  }
  0x24   :  { %s59_s18 = sshll.u32 %s691_s17, 4  ;;  %s60_s18 = int_to_ptr.vmem [resolvable:$true] %s59_s18 }
  0x25   :  { %s646_s19 = scalar_lea.vmem %s60_s18, 1024  ;;  %p651_p2 = scmp.lt.s32.totalorder %s60_s18, %s60_s18 }
  0x26   :  { %p647_p1 = scmp.ne.s32.totalorder %s60_s18, %s646_s19  ;;  %p652_p3 = scmp.lt.s32.totalorder %s646_s19, %s646_s19 }
  0x28   :  { %p653_p4 = por %p652_p3, %p651_p2 }
  0x2a   :  { %p654_p5 = pnand %p653_p4, %p647_p1 }
  0x2c   :  { %657 = shalt.err (!%p654_p5)
}
  0x2d   :  { %65 = dma.hbm_to_vmem [thread:$0]  %s803_s5, 1024, %s60_s18, [#allocation9], %s687_s27, %s687_s27, %s688_s28  }
  0x2e   :  { %678 = dma.done.wait [#allocation3], 64  }
  0x2f   :  { %679 = vsyncadd [#allocation3], 4294967232 }
  0x30   :  { %680 = dma.done.wait [#allocation6], 2048  }
  0x31   :  { %681 = vsyncadd [#allocation6], 4294965248 }
  0x32   :  { %682 = dma.done.wait [#allocation9], 1024  }
  0x33   :  { %683 = vsyncadd [#allocation9], 4294966272  ;;  %v692_v0 = vmov 0.0   ;;  %vm693_vm0 = vmmov 0   ;;  %v554_v1 = vld [vmem:[#allocation5 + $0x38] sm:$0xff]   ;;  %v555_v2 = vld [vmem:[#allocation5 + $0x30] sm:$0xff]   ;;  %v100_v24 = vlaneseq }
  0x34   :  { %485 = vmatprep.subr.bf16.mxu0 %v692_v0  ;;  %501 = vmatprep.mubr.msk.bf16.mxu0 %vm693_vm0, %v692_v0  ;;  %v556_v3 = vld [vmem:[#allocation5 + $0x28] sm:$0xff]   ;;  %v562_v4 = vld [vmem:[#allocation7 + $0x38] sm:$0xff]   ;;  %v557_v5 = vld [vmem:[#allocation5 + $0x20] sm:$0xff]   ;;  %s694_s24 = smov [#allocation10]  }
  0x35   :  { %505 = vmatprep.subr.bf16.mxu1 %v692_v0  ;;  %521 = vmatprep.mubr.msk.bf16.mxu1 %vm693_vm0, %v692_v0  ;;  %v563_v6 = vld [vmem:[#allocation7 + $0x30] sm:$0xff]   ;;  %v558_v7 = vld [vmem:[#allocation5 + $0x18] sm:$0xff]   ;;  %v564_v8 = vld [vmem:[#allocation7 + $0x28] sm:$0xff]   ;;  %v101_v25 = vshrl.u32 %v100_v24, 7  ;;  %s423_s25 = sshll.u32 %s694_s24, 4  ;;  %s424_s25 = int_to_ptr.vmem [resolvable:$true] %s423_s25 }
  0x36   :  { %486 = vmatpush3.bf16.msra.mxu0 %v554_v1  ;;  %506 = vmatpush3.bf16.msra.mxu1 %v562_v4  ;;  %v559_v9 = vld [vmem:[#allocation5 + $0x10] sm:$0xff]   ;;  %v565_v10 = vld [vmem:[#allocation7 + $0x20] sm:$0xff]   ;;  %v560_v11 = vld [vmem:[#allocation5 + $0x8] sm:$0xff]   ;;  %p663_p7 = scmp.lt.s32.totalorder %s424_s25, %s424_s25 }
  0x37   :  { %487 = vmatprep.subr.bf16.mxu0 %v692_v0  ;;  %507 = vmatprep.subr.bf16.mxu1 %v692_v0  ;;  %v566_v12 = vld [vmem:[#allocation7 + $0x18] sm:$0xff]   ;;  %v561_v13 = vld [vmem:[#allocation5] sm:$0xff]   ;;  %v567_v14 = vld [vmem:[#allocation7 + $0x10] sm:$0xff]   ;;  %v102_v28 = vsub.s32 0, %v101_v25 }
  0x38   :  { %v81_v15 = vld [vmem:[#allocation2] sm:$0xf]  ;;  %v568_v16 = vld [vmem:[#allocation7 + $0x8] sm:$0xff]   ;;  %v569_v17 = vld [vmem:[#allocation7] sm:$0xff]  }
  0x39   :  { %v570_v18 = vld [vmem:[#allocation8 + $0x38] sm:$0xff]   ;;  %v571_v19 = vld [vmem:[#allocation8 + $0x30] sm:$0xff]   ;;  %v572_v20 = vld [vmem:[#allocation8 + $0x28] sm:$0xff]  }
  0x3a   :  { %488 = vmatpush3.bf16.msra.mxu0 %v555_v2  ;;  %508 = vmatpush3.bf16.msra.mxu1 %v563_v6  ;;  %v573_v21 = vld [vmem:[#allocation8 + $0x20] sm:$0xff]   ;;  %v574_v22 = vld [vmem:[#allocation8 + $0x18] sm:$0xff]   ;;  %v575_v23 = vld [vmem:[#allocation8 + $0x10] sm:$0xff]  }
  0x3b   :  { %489 = vmatprep.subr.bf16.mxu0 %v692_v0  ;;  %509 = vmatprep.subr.bf16.mxu1 %v692_v0  ;;  %v98_v26 = vld [vmem:[%s800_s2] sm:$0x1]  ;;  %v576_v37 = vld [vmem:[#allocation8 + $0x8] sm:$0xff]   ;;  %v577_v38 = vld [vmem:[#allocation8] sm:$0xff]  }
  0x3c   :  { %v99_v27 = vunpack.c.l.bf16 %v98_v26  ;;  %v210_v39 = vld [vmem:[%s802_s4] sm:$0x1]  ;;  %s658_s4 = scalar_lea.vmem %s424_s25, 128 }
  0x3d   :  { %v211_v40 = vunpack.c.l.bf16 %v210_v39  ;;  %v322_v49 = vld [vmem:[%s804_s6] sm:$0x1]  ;;  %p659_p6 = scmp.ne.s32.totalorder %s424_s25, %s658_s4  ;;  %p664_p8 = scmp.lt.s32.totalorder %s658_s4, %s658_s4 }
  0x3e   :  { %490 = vmatpush3.bf16.msra.mxu0 %v556_v3  ;;  %510 = vmatpush3.bf16.msra.mxu1 %v564_v8  ;;  %v103_v29 = vrot.slane %v99_v27, %v102_v28  ;;  %v323_v50 = vunpack.c.l.bf16 %v322_v49 }
  0x3f   :  { %491 = vmatprep.subr.bf16.mxu0 %v692_v0  ;;  %511 = vmatprep.subr.bf16.mxu1 %v692_v0  ;;  %v215_v41 = vrot.slane %v211_v40, %v102_v28  ;;  %p665_p9 = por %p664_p8, %p663_p7 }
  0x40   :  { %v327_v51 = vrot.slane %v323_v50, %v102_v28 }
  0x41   :  { %p666_p10 = pnand %p665_p9, %p659_p6 }
  0x42   :  { %492 = vmatpush3.bf16.msra.mxu0 %v557_v5  ;;  %512 = vmatpush3.bf16.msra.mxu1 %v565_v10 }
  0x43   :  { %493 = vmatprep.subr.bf16.mxu0 %v692_v0  ;;  %513 = vmatprep.subr.bf16.mxu1 %v692_v0 }
  0x46   :  { %494 = vmatpush3.bf16.msra.mxu0 %v558_v7  ;;  %514 = vmatpush3.bf16.msra.mxu1 %v566_v12 }
  0x47   :  { %495 = vmatprep.subr.bf16.mxu0 %v692_v0  ;;  %515 = vmatprep.subr.bf16.mxu1 %v692_v0 }
  0x4a   :  { %496 = vmatpush3.bf16.msra.mxu0 %v559_v9  ;;  %516 = vmatpush3.bf16.msra.mxu1 %v567_v14 }
  0x4b   :  { %497 = vmatprep.subr.bf16.mxu0 %v692_v0  ;;  %517 = vmatprep.subr.bf16.mxu1 %v692_v0 }
  0x4e   :  { %498 = vmatpush3.bf16.msra.mxu0 %v560_v11  ;;  %518 = vmatpush3.bf16.msra.mxu1 %v568_v16 }
  0x4f   :  { %499 = vmatprep.subr.bf16.mxu0 %v692_v0  ;;  %519 = vmatprep.subr.bf16.mxu1 %v692_v0 }
  0x52   :  { %500 = vmatpush3.bf16.msra.mxu0 %v561_v13  ;;  %520 = vmatpush3.bf16.msra.mxu1 %v569_v17 }
  0x53   :  { %525 = vmatprep.subr.bf16.mxu0 %v692_v0 }
  0x55   :  { %502 = vmatmul.mubr.bf16.vlgmr.msra.gmra.mxu0 %v81_v15 }
  0x56   :  { %541 = vmatprep.mubr.msk.bf16.mxu0 %vm693_vm0, %v692_v0  ;;  %526 = vmatpush3.bf16.msra.mxu0 %v570_v18 }
  0x57   :  { %527 = vmatprep.subr.bf16.mxu0 %v692_v0 }
  0x5a   :  { %528 = vmatpush3.bf16.msra.mxu0 %v571_v19 }
  0x5b   :  { %529 = vmatprep.subr.bf16.mxu0 %v692_v0 }
  0x5e   :  { %530 = vmatpush3.bf16.msra.mxu0 %v572_v20 }
  0x5f   :  { %531 = vmatprep.subr.bf16.mxu0 %v692_v0 }
  0x62   :  { %532 = vmatpush3.bf16.msra.mxu0 %v573_v21 }
  0x63   :  { %533 = vmatprep.subr.bf16.mxu0 %v692_v0 }
  0x66   :  { %534 = vmatpush3.bf16.msra.mxu0 %v574_v22 }
  0x67   :  { %535 = vmatprep.subr.bf16.mxu0 %v692_v0 }
  0x6a   :  { %536 = vmatpush3.bf16.msra.mxu0 %v575_v23 }
  0x6b   :  { %537 = vmatprep.subr.bf16.mxu0 %v692_v0 }
  0x6e   :  { %538 = vmatpush3.bf16.msra.mxu0 %v576_v37 }
  0x6f   :  { %539 = vmatprep.subr.bf16.mxu0 %v692_v0 }
  0x72   :  { %540 = vmatpush3.bf16.msra.mxu0 %v577_v38 }
 0x115   :  { %v186_v30 = vpop.f32.mrf.mxu0 }
 0x116   :  { %v187_v31 = vadd.f32 %v186_v30, %v103_v29 }
 0x117   :  { %v503_v32 = vpop.f32.mrf.mxu0 }
 0x118   :  { %v192_v33 = vmax.f32 %v187_v31, 0.0 }
 0x119   :  { %v189_v34 = vpop.f32.mrf.mxu0 }
 0x11a   :  { %v193_v35 = vpack.c.bf16 %v192_v33, %v192_v33 }
 0x11b   :  { %v504_v36 = vpop.f32.mrf.mxu0 }
 0x11c   :  { %522 = vmatmul.mubr.bf16.vlgmr.msra.gmra.mxu1 %v193_v35 }
 0x1dc   :  { %v298_v42 = vpop.f32.mrf.mxu1 }
 0x1dd   :  { %v299_v43 = vadd.f32 %v298_v42, %v215_v41 }
 0x1de   :  { %v523_v44 = vpop.f32.mrf.mxu1 }
 0x1df   :  { %v304_v45 = vmax.f32 %v299_v43, 0.0 }
 0x1e0   :  { %v301_v46 = vpop.f32.mrf.mxu1 }
 0x1e1   :  { %v305_v47 = vpack.c.bf16 %v304_v45, %v304_v45 }
 0x1e2   :  { %v524_v48 = vpop.f32.mrf.mxu1 }
 0x1e3   :  { %542 = vmatmul.mubr.bf16.vlgmr.msra.gmra.mxu0 %v305_v47 }
 0x2a3   :  { %v410_v52 = vpop.f32.mrf.mxu0 }
 0x2a4   :  { %v411_v53 = vadd.f32 %v410_v52, %v327_v51 }
 0x2a5   :  { %v543_v54 = vpop.f32.mrf.mxu0 }
 0x2a6   :  { %416 = vst [vmem:[#allocation10] sm:$0xff] %v411_v53 }
 0x2a7   :  { %v413_v55 = vpop.f32.mrf.mxu0 }
 0x2a8   :  { %669 = shalt.err (!%p666_p10)
}
 0x2a9   :  { %426 = dma.vmem_to_hbm [thread:$0]  %s424_s25, 128, %s805_s7, [#allocation4]   ;;  %v544_v56 = vpop.f32.mrf.mxu0 }
 0x2aa   :  { %684 = dma.done.wait [#allocation4], 128  }
 0x2ab   :  { %685 = vsyncadd [#allocation4], 4294967168 }
 0x2ac   :  { %430 = vsyncpa [#allocation3], 1 }
 0x2ad   :  { %431 = vsyncpa [#allocation6], 1 }
 0x2ae   :  { %432 = vsyncpa [#allocation9], 1 }
 0x2af   :  { %433 = vsyncpa [#allocation4], 1 }

</bundles_post_ra>
